<compile_context>
chip_gen: v7x
topology: tpu7x:2x2x1
jax: 0.10.0
libtpu: 0.0.40
codegen_flags: <defaults>
</compile_context>

<pallas_src>
import functools
from typing import NamedTuple, Tuple

import jax
import jax.numpy as jnp
from jax.experimental import pallas as pl
from jax.experimental.pallas import tpu as pltpu


def _round_up(x: int, m: int) -> int:
    return (x + m - 1) // m * m


# ----------------------------- packed layout ---------------------------------
class Layout(NamedTuple):
    L: int              # num_letters
    C: int              # num_classes
    S: int              # state_size
    H: int              # hidden_layer_size
    count: int          # hidden_layer_count
    LK: int             # L + C
    C0: int             # round_up(2H, 128)  width of hidden activations
    C2: int             # round_up(2S, 128)  width of [state|output] activation
    CL: int             # round_up(L, 128)   width of score
    P: int              # lane width of the packed param arrays
    Srd: int            # round_up(S, 16)    rows used by the recurrent weight
    o_w0s: int          # row offsets into the bf16 packed weight array
    o_mid: Tuple[int, ...]
    o_last: int
    o_wf: int
    rowsW: int
    rowsB: int


def make_layout(L, C, S, H, count) -> Layout:
    LK = L + C
    C0 = _round_up(2 * H, 128)
    C2 = _round_up(2 * S, 128)
    CL = _round_up(L, 128)
    P = max(C0, C2, CL)
    Srd = _round_up(S, 16)
    o = 0
    o_w0s = o; o += Srd                 # recurrent weight  [S, 2H]  (fused paths)
    o_mid = []
    for _ in range(count - 1):
        o_mid.append(o); o += C0        # block-diag hidden [2H, 2H]
    o_last = o; o += C0                 # block-diag last   [2H, 2S]
    o_wf = o;   o += C2                 # score weight      [2S, L]
    rowsW = _round_up(o, 16)            # bf16: keep sublane-pair alignment
    rowsB = 8 * (count + 1)             # one 8-aligned row per fused bias
    return Layout(L, C, S, H, count, LK, C0, C2, CL, P, Srd,
                  o_w0s, tuple(o_mid), o_last, o_wf, rowsW, rowsB)


def _block_diag(a, b):
    ra, ca = a.shape
    rb, cb = b.shape
    return jnp.block([[a, jnp.zeros((ra, cb), a.dtype)],
                      [jnp.zeros((rb, ca), b.dtype), b]])


def pack_params(p, lay: Layout):
    """Fuse the two MLP paths.  Returns:
       wp    bf16 [rowsW, P]  -- all recurrence/score weights (VMEM-resident)
       bp    f32  [rowsB, P]  -- fused biases, one per 8-aligned row
       w0in  f32  [LK, 2H]    -- input-projection weight (used wrapper-side)
       b0    f32  [2H]        -- input-projection bias   (folded into `pre`)
    """
    wp = jnp.zeros((lay.rowsW, lay.P), jnp.float32)

    def put(buf, r, a):
        return buf.at[r:r + a.shape[0], :a.shape[1]].set(a)

    # layer 0: column-concat -> [input, 2H]; split rows into (letter|class) / state
    w0 = jnp.concatenate([p["ws"][0], p["wo"][0]], axis=1)
    w0in = w0[:lay.LK]                                   # [LK, 2H]  stays f32
    b0 = jnp.concatenate([p["bs"][0], p["bo"][0]])       # [2H]
    wp = put(wp, lay.o_w0s, w0[lay.LK:])                 # [S, 2H] recurrent part
    for j in range(lay.count - 1):
        wp = put(wp, lay.o_mid[j], _block_diag(p["ws"][1 + j], p["wo"][1 + j]))
    wp = put(wp, lay.o_last, _block_diag(p["ws"][-1], p["wo"][-1]))   # [2H, 2S]
    wp = put(wp, lay.o_wf, p["wf"])                                   # [2S, L]
    wp = wp.astype(jnp.bfloat16)

    bp = jnp.zeros((lay.rowsB, lay.P), jnp.float32)
    fused = ([jnp.concatenate([p["bs"][1 + j], p["bo"][1 + j]])
              for j in range(lay.count - 1)]
             + [jnp.concatenate([p["bs"][-1], p["bo"][-1]])]
             + [p["bf"]])
    for j, b in enumerate(fused):
        bp = bp.at[8 * j, :b.shape[0]].set(b)
    return wp, bp, w0in, b0


# ----------------------------- Pallas kernel ---------------------------------
def _rnn_scan_kernel(pre_ref, state0_ref, wp_ref, bp_ref,
                     scores_ref, state_ref, *, lay: Layout, U: int):
    t = pl.program_id(1)   # time axis (MUST be "arbitrary": resident state carry)

    # Initialize this batch shard's resident carry once per sequence.
    @pl.when(t == 0)
    def _():
        state_ref[...] = state0_ref[...]

    # ---- weight / bias slices hoisted out of the U-step loop ----------------
    w0_s = wp_ref[lay.o_w0s:lay.o_w0s + lay.Srd, :lay.C0]        # bf16 [Srd, 2H]
    w_mid = [wp_ref[o:o + lay.C0, :lay.C0] for o in lay.o_mid]   # bf16 [2H, 2H]
    w_last = wp_ref[lay.o_last:lay.o_last + lay.C0, :lay.C2]     # bf16 [2H, 2S]
    w_f = wp_ref[lay.o_wf:lay.o_wf + lay.C2, :lay.CL]            # bf16 [2S, L]
    b_mid = [bp_ref[8 * j:8 * j + 1, :lay.C0] for j in range(lay.count - 1)]
    b_last = bp_ref[8 * (lay.count - 1):8 * (lay.count - 1) + 1, :lay.C2]
    b_f = bp_ref[8 * lay.count:8 * lay.count + 1, :lay.CL]

    def dotb(a, w):  # bf16 MXU operands, f32 accumulation
        return jnp.dot(a.astype(jnp.bfloat16), w,
                       preferred_element_type=jnp.float32)

    carry = state_ref[...]                                       # f32 [BS, C2]
    for u in range(U):                                           # static unroll
        pre_u = pre_ref[u]                    # [BS, C0] f32, input proj + bias0
        # recurrence: only the state lanes / weight rows (K = Srd ~ state_size)
        h = jnp.maximum(pre_u + dotb(carry[:, :lay.Srd], w0_s), 0.0)
        for j in range(lay.count - 1):
            h = jnp.maximum(dotb(h, w_mid[j]) + b_mid[j], 0.0)
        so = jnp.maximum(dotb(h, w_last) + b_last, 0.0)          # [state|output]
        scores_ref[u, :, :] = dotb(so, w_f) + b_f
        carry = so
    state_ref[...] = carry


# ------------------------------- wrappers -------------------------------------
def make_scan_fn(lay: Layout, *, batch_shard: int = 8, steps_per_block: int = 8):
    """Teacher-forced multi-step scan: T forward() steps, U per grid iteration.

    batch_shard: rows per grid block along batch.  Raise toward 128 (v5e) /
    256 (v6e, v7x) when the workload supplies more independent sequences --
    per-step latency is ~flat until the MXU rows fill up.
    """
    BS = batch_shard

    def scan_fn(letter_seq, klass, state0, wp, bp, w0in, b0):
        T, B, _ = letter_seq.shape
        B_pad = _round_up(max(B, BS), BS)
        n_shards = B_pad // BS
        U = 1
        for u in range(min(steps_per_block, T), 0, -1):
            if T % u == 0:
                U = u
                break
        Tt = T // U

        # Input projection hoisted out of the serial recurrence: one big matmul
        # over the whole sequence (bias folded in), done by XLA on the MXU.
        lk = jnp.concatenate(
            [letter_seq, jnp.broadcast_to(klass[None], (T, B, lay.C))], axis=-1)
        pre = jnp.einsum("tbi,io->tbo", lk, w0in,
                         preferred_element_type=jnp.float32) + b0
        pre = jnp.pad(pre, ((0, 0), (0, B_pad - B), (0, lay.C0 - 2 * lay.H)))
        st0 = jnp.pad(state0, ((0, B_pad - B), (0, lay.C2 - lay.S)))

        kernel = functools.partial(_rnn_scan_kernel, lay=lay, U=U)
        scores, state = pl.pallas_call(
            kernel,
            grid=(n_shards, Tt),
            in_specs=[
                pl.BlockSpec((U, BS, lay.C0), lambda b, t: (t, b, 0)),
                pl.BlockSpec((BS, lay.C2), lambda b, t: (b, 0)),
                pl.BlockSpec((lay.rowsW, lay.P), lambda b, t: (0, 0)),
                pl.BlockSpec((lay.rowsB, lay.P), lambda b, t: (0, 0)),
            ],
            out_specs=(
                pl.BlockSpec((U, BS, lay.CL), lambda b, t: (t, b, 0)),
                pl.BlockSpec((BS, lay.C2), lambda b, t: (b, 0)),
            ),
            out_shape=(
                jax.ShapeDtypeStruct((T, B_pad, lay.CL), jnp.float32),
                jax.ShapeDtypeStruct((B_pad, lay.C2), jnp.float32),
            ),
            compiler_params=pltpu.CompilerParams(
                # Batch-shard axis is parallel (feeds the 2nd TC on v7x).
                # The time axis MUST stay "arbitrary": the final-state output
                # block is the resident recurrence carry across it.
                dimension_semantics=("parallel", "arbitrary")),
        )(pre, st0, wp, bp)

        return scores[:, :B, :lay.L], state[:B, :lay.S]

    return jax.jit(scan_fn)


def forward(scan_fn, letter, klass, state, packed):
    """Exactly RnnConditionalGenerator.forward (single step) via the scan."""
    scores, new_state = scan_fn(letter[None], klass, state, *packed)
    return scores[0], new_state


# ----------------------- unfused params + references --------------------------
def make_params(key, L, C, S, H, count):
    """He init, weights stored [in, out] (transposed vs nn.Linear)."""
    input_size = L + C + S
    sizes = [(input_size, H)] + [(H, H)] * (count - 1) + [(H, S)]
    n = len(sizes)
    keys = jax.random.split(key, 4 * n + 2)

    def he(k, fi, fo):
        return jax.random.normal(k, (fi, fo), jnp.float32) * (2.0 / fi) ** 0.5

    def bias(k, fi, fo):
        bound = fi ** -0.5
        return jax.random.uniform(k, (fo,), jnp.float32, -bound, bound)

    ws, bs, wo, bo = [], [], [], []
    for i, (fi, fo) in enumerate(sizes):
        ws.append(he(keys[4 * i + 0], fi, fo))
        bs.append(bias(keys[4 * i + 1], fi, fo))
        wo.append(he(keys[4 * i + 2], fi, fo))
        bo.append(bias(keys[4 * i + 3], fi, fo))
    wf = he(keys[-2], 2 * S, L)
    bf = bias(keys[-1], 2 * S, L)
    return {"ws": ws, "bs": bs, "wo": wo, "bo": bo, "wf": wf, "bf": bf}


def reference_step(letter, klass, state, p):
    """Pure f32 reference -- the PyTorch module's forward()."""
    x = jnp.concatenate([letter, klass, state], axis=1)
    relu = lambda v: jnp.maximum(v, 0.0)
    h = x
    for w, b in zip(p["ws"], p["bs"]):
        h = relu(h @ w + b)
    g = x
    for w, b in zip(p["wo"], p["bo"]):
        g = relu(g @ w + b)
    score = jnp.concatenate([h, g], axis=1) @ p["wf"] + p["bf"]
    return score, h


def reference_step_quant(letter, klass, state, p, lay: Layout):
    """Reference matching the kernel's math: f32 input projection, bf16 MXU
    operands with f32 accumulation elsewhere, f32 bias/ReLU epilogue."""
    lk = jnp.concatenate([letter, klass], axis=1)
    w0 = jnp.concatenate([p["ws"][0], p["wo"][0]], axis=1)
    b0 = jnp.concatenate([p["bs"][0], p["bo"][0]])
    pre = lk @ w0[:lay.LK] + b0

    q = lambda a: a.astype(jnp.bfloat16)
    dotb = lambda a, w: jnp.dot(q(a), q(w), preferred_element_type=jnp.float32)

    h = jnp.maximum(pre + dotb(state, w0[lay.LK:]), 0.0)
    for j in range(lay.count - 1):
        wj = _block_diag(p["ws"][1 + j], p["wo"][1 + j])
        bj = jnp.concatenate([p["bs"][1 + j], p["bo"][1 + j]])
        h = jnp.maximum(dotb(h, wj) + bj, 0.0)
    wl = _block_diag(p["ws"][-1], p["wo"][-1])
    bl = jnp.concatenate([p["bs"][-1], p["bo"][-1]])
    so = jnp.maximum(dotb(h, wl) + bl, 0.0)
    score = dotb(so, p["wf"]) + p["bf"]
    return score, so[:, :lay.S]


# --------------------------------- main ---------------------------------------
if __name__ == "__main__":
    letters = "abcdefghijklmnopqrstuvwxyz^$"       # 28 letters incl. start/end
    L, C, S, H, count = len(letters), 4, 32, 64, 2  # 2H = 128 lanes exactly
    B, T = 16, 8                                    # 2 batch shards of 8, U = 4

    key = jax.random.PRNGKey(0)
    k_p, k_l, k_c, k_s, k_seq = jax.random.split(key, 5)

    params = make_params(k_p, L, C, S, H, count)
    lay = make_layout(L, C, S, H, count)
    packed = pack_params(params, lay)
    scan_fn = make_scan_fn(lay, batch_shard=8, steps_per_block=4)

    letter = jax.nn.one_hot(jax.random.randint(k_l, (B,), 0, L), L,
                            dtype=jnp.float32)
    klass = jax.nn.one_hot(jax.random.randint(k_c, (B,), 0, C), C,
                           dtype=jnp.float32)
    state = jax.random.normal(k_s, (B, S), jnp.float32)

    # --- single-step forward (module.forward semantics) ---
    score, new_state = forward(scan_fn, letter, klass, state, packed)
    jax.block_until_ready((score, new_state))
    assert score.shape == (B, L) and new_state.shape == (B, S)

    # quantization-matched reference (same math as the kernel): tight tolerance
    q_score, q_state = reference_step_quant(letter, klass, state, params, lay)
    assert jnp.allclose(score, q_score, atol=5e-3, rtol=5e-3)
    assert jnp.allclose(new_state, q_state, atol=5e-3, rtol=5e-3)

    # f32 module reference: agreement within the bf16 weight-quantization bound
    f_score, f_state = reference_step(letter, klass, state, params)
    assert jnp.allclose(score, f_score, atol=1e-1, rtol=1e-1)
    assert jnp.allclose(new_state, f_state, atol=1e-1, rtol=1e-1)

    # --- fused T-step teacher-forced scan (time loop inside the kernel) ---
    letter_seq = jax.nn.one_hot(jax.random.randint(k_seq, (T, B), 0, L), L,
                                dtype=jnp.float32)
    scores, final_state = scan_fn(letter_seq, klass, state, *packed)
    jax.block_until_ready((scores, final_state))
    assert scores.shape == (T, B, L) and final_state.shape == (B, S)

    st = state
    ref_scores = []
    for t in range(T):
        sc, st = reference_step_quant(letter_seq[t], klass, st, params, lay)
        ref_scores.append(sc)
    ref_scores = jnp.stack(ref_scores)
    assert jnp.allclose(scores, ref_scores, atol=1e-2, rtol=1e-2)
    assert jnp.allclose(final_state, st, atol=1e-2, rtol=1e-2)

    print("KERNEL_OK")
</pallas_src>

<mosaic_0001>
module attributes {stable_mosaic.version = 11 : i64} {
  func.func @_rnn_scan_kernel(%arg0: i32, %arg1: i32, %arg2: memref<1x8x128xf32, #tpu.memory_space<vmem>>, %arg3: memref<8x128xf32, #tpu.memory_space<vmem>>, %arg4: memref<416x128xbf16, #tpu.memory_space<vmem>>, %arg5: memref<24x128xf32, #tpu.memory_space<vmem>>, %arg6: memref<1x8x128xf32, #tpu.memory_space<vmem>>, %arg7: memref<8x128xf32, #tpu.memory_space<vmem>>) attributes {dimension_semantics = [#tpu.dimension_semantics<parallel>, #tpu.dimension_semantics<arbitrary>], iteration_bounds = array<i64: 2, 1>, scalar_prefetch = 0 : i64, scratch_operands = 0 : i64, tpu.core_type = #tpu.core_type<tc>, window_params = [{transform_indices = @transform_0, window_bounds = array<i64: 1, 8, 128>}, {transform_indices = @transform_1, window_bounds = array<i64: 8, 128>}, {pipeline_mode = #tpu.pipeline_mode<synchronous>, transform_indices = @transform_2, window_bounds = array<i64: 416, 128>}, {pipeline_mode = #tpu.pipeline_mode<synchronous>, transform_indices = @transform_3, window_bounds = array<i64: 24, 128>}, {transform_indices = @transform_4, window_bounds = array<i64: 1, 8, 128>}, {transform_indices = @transform_5, window_bounds = array<i64: 8, 128>}]} {
    %c0_i32 = arith.constant 0 : i32
    %0 = arith.cmpi eq, %arg1, %c0_i32 : i32
    %1 = arith.extui %0 : i1 to i32
    %c0_i32_0 = arith.constant 0 : i32
    %2 = arith.cmpi ne, %1, %c0_i32_0 : i32
    scf.if %2 {
      %c0_25 = arith.constant 0 : index
      %c0_26 = arith.constant 0 : index
      %39 = vector.load %arg3[%c0_25, %c0_26] : memref<8x128xf32, #tpu.memory_space<vmem>>, vector<8x128xf32>
      %c0_27 = arith.constant 0 : index
      %c0_28 = arith.constant 0 : index
      %40 = vector.load %arg7[%c0_27, %c0_28] : memref<8x128xf32, #tpu.memory_space<vmem>>, vector<8x128xf32>
      tpu.vector_store %arg7[%c0_27, %c0_28], %39 {strides = array<i32>} : memref<8x128xf32, #tpu.memory_space<vmem>>, vector<8x128xf32>,
    } else {
    }
    %c0 = arith.constant 0 : index
    %c0_1 = arith.constant 0 : index
    %3 = vector.load %arg4[%c0, %c0_1] : memref<416x128xbf16, #tpu.memory_space<vmem>>, vector<32x128xbf16>
    %c32 = arith.constant 32 : index
    %c0_2 = arith.constant 0 : index
    %4 = vector.load %arg4[%c32, %c0_2] : memref<416x128xbf16, #tpu.memory_space<vmem>>, vector<128x128xbf16>
    %c160 = arith.constant 160 : index
    %c0_3 = arith.constant 0 : index
    %5 = vector.load %arg4[%c160, %c0_3] : memref<416x128xbf16, #tpu.memory_space<vmem>>, vector<128x128xbf16>
    %c288 = arith.constant 288 : index
    %c0_4 = arith.constant 0 : index
    %6 = vector.load %arg4[%c288, %c0_4] : memref<416x128xbf16, #tpu.memory_space<vmem>>, vector<128x128xbf16>
    %c0_5 = arith.constant 0 : index
    %c0_6 = arith.constant 0 : index
    %7 = vector.load %arg5[%c0_5, %c0_6] : memref<24x128xf32, #tpu.memory_space<vmem>>, vector<1x128xf32>
    %c8 = arith.constant 8 : index
    %c0_7 = arith.constant 0 : index
    %8 = vector.load %arg5[%c8, %c0_7] : memref<24x128xf32, #tpu.memory_space<vmem>>, vector<1x128xf32>
    %c16 = arith.constant 16 : index
    %c0_8 = arith.constant 0 : index
    %9 = vector.load %arg5[%c16, %c0_8] : memref<24x128xf32, #tpu.memory_space<vmem>>, vector<1x128xf32>
    %c0_9 = arith.constant 0 : index
    %c0_10 = arith.constant 0 : index
    %10 = vector.load %arg7[%c0_9, %c0_10] : memref<8x128xf32, #tpu.memory_space<vmem>>, vector<8x128xf32>
    %c0_11 = arith.constant 0 : index
    %c0_12 = arith.constant 0 : index
    %c0_13 = arith.constant 0 : index
    %11 = vector.load %arg2[%c0_11, %c0_12, %c0_13] : memref<1x8x128xf32, #tpu.memory_space<vmem>>, vector<1x8x128xf32>
    %12 = vector.shape_cast %11 : vector<1x8x128xf32> to vector<8x128xf32>
    %13 = vector.extract_strided_slice %10 {offsets = [0, 0], sizes = [8, 32], strides = [1, 1]} : vector<8x128xf32> to vector<8x32xf32>
    %14 = arith.truncf %13 : vector<8x32xf32> to vector<8x32xbf16>
    %cst = arith.constant dense<0.000000e+00> : vector<8x128xf32>
    %15 = tpu.matmul %14, %3, %cst {dimension_numbers = #tpu.dot_dimension_numbers<[1], [0], [0], [1], [0, 0, 1, 1], [], []>} : vector<8x32xbf16>, vector<32x128xbf16>, vector<8x128xf32> -> vector<8x128xf32>
    %16 = arith.addf %12, %15 : vector<8x128xf32>
    %cst_14 = arith.constant 0.000000e+00 : f32
    %17 = vector.broadcast %cst_14 : f32 to vector<8x128xf32>
    %18 = arith.maximumf %16, %17 : vector<8x128xf32>
    %19 = arith.truncf %18 : vector<8x128xf32> to vector<8x128xbf16>
    %cst_15 = arith.constant dense<0.000000e+00> : vector<8x128xf32>
    %20 = tpu.matmul %19, %4, %cst_15 {dimension_numbers = #tpu.dot_dimension_numbers<[1], [0], [0], [1], [0, 0, 1, 1], [], []>} : vector<8x128xbf16>, vector<128x128xbf16>, vector<8x128xf32> -> vector<8x128xf32>
    %21 = vector.broadcast %7 : vector<1x128xf32> to vector<8x128xf32>
    %22 = arith.addf %20, %21 : vector<8x128xf32>
    %cst_16 = arith.constant 0.000000e+00 : f32
    %23 = vector.broadcast %cst_16 : f32 to vector<8x128xf32>
    %24 = arith.maximumf %22, %23 : vector<8x128xf32>
    %25 = arith.truncf %24 : vector<8x128xf32> to vector<8x128xbf16>
    %cst_17 = arith.constant dense<0.000000e+00> : vector<8x128xf32>
    %26 = tpu.matmul %25, %5, %cst_17 {dimension_numbers = #tpu.dot_dimension_numbers<[1], [0], [0], [1], [0, 0, 1, 1], [], []>} : vector<8x128xbf16>, vector<128x128xbf16>, vector<8x128xf32> -> vector<8x128xf32>
    %27 = vector.broadcast %8 : vector<1x128xf32> to vector<8x128xf32>
    %28 = arith.addf %26, %27 : vector<8x128xf32>
    %cst_18 = arith.constant 0.000000e+00 : f32
    %29 = vector.broadcast %cst_18 : f32 to vector<8x128xf32>
    %30 = arith.maximumf %28, %29 : vector<8x128xf32>
    %31 = arith.truncf %30 : vector<8x128xf32> to vector<8x128xbf16>
    %cst_19 = arith.constant dense<0.000000e+00> : vector<8x128xf32>
    %32 = tpu.matmul %31, %6, %cst_19 {dimension_numbers = #tpu.dot_dimension_numbers<[1], [0], [0], [1], [0, 0, 1, 1], [], []>} : vector<8x128xbf16>, vector<128x128xbf16>, vector<8x128xf32> -> vector<8x128xf32>
    %33 = vector.broadcast %9 : vector<1x128xf32> to vector<8x128xf32>
    %34 = arith.addf %32, %33 : vector<8x128xf32>
    %c0_20 = arith.constant 0 : index
    %c0_21 = arith.constant 0 : index
    %c0_22 = arith.constant 0 : index
    %35 = vector.load %arg6[%c0_20, %c0_21, %c0_22] : memref<1x8x128xf32, #tpu.memory_space<vmem>>, vector<1x8x128xf32>
    %36 = vector.shape_cast %35 : vector<1x8x128xf32> to vector<8x128xf32>
    %37 = vector.shape_cast %34 : vector<8x128xf32> to vector<1x8x128xf32>
    tpu.vector_store %arg6[%c0_20, %c0_21, %c0_22], %37 {strides = array<i32>} : memref<1x8x128xf32, #tpu.memory_space<vmem>>, vector<1x8x128xf32>,
    %c0_23 = arith.constant 0 : index
    %c0_24 = arith.constant 0 : index
    %38 = vector.load %arg7[%c0_23, %c0_24] : memref<8x128xf32, #tpu.memory_space<vmem>>, vector<8x128xf32>
    tpu.vector_store %arg7[%c0_23, %c0_24], %30 {strides = array<i32>} : memref<8x128xf32, #tpu.memory_space<vmem>>, vector<8x128xf32>,
    return
  }
  func.func @transform_0(%arg0: i32, %arg1: i32) -> (i32, i32, i32) {
    %c0_i32 = arith.constant 0 : i32
    %c0_i32_0 = arith.constant 0 : i32
    return %arg1, %arg0, %c0_i32 : i32, i32, i32
  }
  func.func @transform_1(%arg0: i32, %arg1: i32) -> (i32, i32) {
    %c0_i32 = arith.constant 0 : i32
    %c0_i32_0 = arith.constant 0 : i32
    return %arg0, %c0_i32 : i32, i32
  }
  func.func @transform_2(%arg0: i32, %arg1: i32) -> (i32, i32) {
    %c0_i32 = arith.constant 0 : i32
    %c0_i32_0 = arith.constant 0 : i32
    %c0_i32_1 = arith.constant 0 : i32
    return %c0_i32, %c0_i32_0 : i32, i32
  }
  func.func @transform_3(%arg0: i32, %arg1: i32) -> (i32, i32) {
    %c0_i32 = arith.constant 0 : i32
    %c0_i32_0 = arith.constant 0 : i32
    %c0_i32_1 = arith.constant 0 : i32
    return %c0_i32, %c0_i32_0 : i32, i32
  }
  func.func @transform_4(%arg0: i32, %arg1: i32) -> (i32, i32, i32) {
    %c0_i32 = arith.constant 0 : i32
    %c0_i32_0 = arith.constant 0 : i32
    return %arg1, %arg0, %c0_i32 : i32, i32, i32
  }
  func.func @transform_5(%arg0: i32, %arg1: i32) -> (i32, i32) {
    %c0_i32 = arith.constant 0 : i32
    %c0_i32_0 = arith.constant 0 : i32
    return %arg0, %c0_i32 : i32, i32
  }
}

</mosaic_0001>

<bundles_post_ra>
// kernel: scan_fn.1
= control target key start
LH: loop header
LB: loop body
LE: loop exit
PB: predicated region body
PF: predicated region fallthrough
CT: control target
= control target key end

     0   :  { %11 = vsyncpa [#allocation3], 0  ;;  %s1527_s0 = inlined_call_operand.vmem [shape: f32[1,16,128], index: 0, kind: input, shape index: {}]   ;;  %s1528_s1 = inlined_call_operand.vmem [shape: f32[16,128], index: 1, kind: input, shape index: {}]   ;;  %s1529_s2 = inlined_call_operand.hbm [shape: bf16[416,128], index: 2, kind: input, shape index: {}]   ;;  %s1530_s3 = inlined_call_operand.vmem [shape: f32[24,128], index: 3, kind: input, shape index: {}]   ;;  %s1531_s4 = inlined_call_operand.hbm [shape: f32[1,16,128], index: 4, kind: output, shape index: {0}]   ;;  %s1532_s5 = inlined_call_operand.hbm [shape: f32[16,128], index: 5, kind: output, shape index: {1}]  }
   0x1   :  { %12 = vsyncpa [#allocation4], 0 }
   0x2   :  { %14 = vsyncpa [#allocation4 + $0x1], 0 }
   0x3   :  { %15 = vsyncpa [#allocation7], 0 }
   0x4   :  { %17 = vsyncpa [#allocation7 + $0x1], 0  ;;  %s1289_s18 = smov 0   ;;  %s1291_s19 = smov 0  }
   0x5   :  { %s1293_s20 = smov 0   ;;  %s1295_s21 = smov 0  }
   0x6   :  { %s1297_s22 = smov 0   ;;  %s1299_s23 = smov 0  }
   0x7 LB: > { %s862_s24 = sadd.s32 4294967295, %s1250_s23   ;;  %s863_s25 = sadd.s32 4294967294, %s1250_s23   ;;  %s1250_s23 = sphi %s1299_s23, %s23_s23   ;;  %s1246_s22 = sphi %s1297_s22, %s1550_s22   ;;  %s1242_s21 = sphi %s1295_s21, %s1549_s21   ;;  %s1238_s20 = sphi %s1293_s20, %s1548_s20   ;;  %s1234_s19 = sphi %s1291_s19, %s1547_s19   ;;  %s1230_s18 = sphi %s1289_s18, %s1546_s18  }
   0x8   : > { %s35_s26 = sadd.s32 1, %s1246_s22  ;;  %s140_s27 = sadd.s32 1, %s1238_s20 }
   0x9   : > { %p37_p0 = scmp.ge.s32.totalorder %s35_s26, 2  ;;  %p150_p1 = scmp.ne.s32.totalorder %s1238_s20, %s1234_s19 }
   0xa   : > { %p151_p2 = scmp.eq.s32.totalorder %s862_s24, 1  ;;  %p156_p3 = scmp.ne.s32.totalorder %s1234_s19, %s1230_s18 }
   0xb   : > { %s1552_s26 = smov (%p37_p0, %s35_s26), 0  ;;  %p157_p5 = scmp.eq.s32.totalorder %s863_s25, 1 }
   0xc   : > { %p1329_p4 = por %p151_p2, %p150_p1  ;;  %s136_s29 = ssub.s32 %s1246_s22, %s1552_s26 }
   0xd   : > { %p864_p6 = scmp.ge.s32.totalorder %s1250_s23, 1  ;;  %p138_p7 = scmp.eq.s32.totalorder %s136_s29, 0 }
   0xe   : > { %s1537_s28 = scalar_select %p1329_p4, 1, 0 }
   0xf   : > { %p1336_p8 = por %p157_p5, %p156_p3  ;;  %p190_p9 = scmp.lt.s32.totalorder %s1250_s23, 3 }
  0x10   : > { %s1342_s6 = scalar_select %p138_p7, %s1238_s20, %s140_s27  }
  0x11   : > { %s1538_s30 = scalar_select %p1336_p8, 1, 0 }
  0x12   : > { %p1344_p10 = pnand %p864_p6, %p190_p9  ;;  %p1348_p11 = scmp.eq.s32.totalorder %s862_s24, 0 }
  0x13   : > { %s1252_s9 = smov [#allocation2]   ;;  %s1108_s14 = scalar_lea.hbm %s1529_s2, 3328 }
  0x14   : > { %s1539_s7 = scalar_select %p1344_p10, 1, 0 }
  0x15   : > { %s1540_s8 = scalar_select %p1348_p11, 1, 0 }
  0x16   : > { %p1015_p12 = pneg %p1344_p10  ;;  %s202_s10 = sshll.u32 %s1252_s9, 4  ;;  %s203_s10 = int_to_ptr.vmem [resolvable:$true] %s202_s10 }
  0x17   : > { %p1109_p0 = scmp.ne.s32.totalorder %s1529_s2, %s1108_s14  ;;  %p1115_p5 = scmp.lt.u32.totalorder %s1108_s14, %s1529_s2 }
  0x18   : > { %p1356_p13 = pnand %p1348_p11, %p1015_p12 }
  0x1a   : > { %p1110_p1 = pneg %p1356_p13 }
  0x1c   : > { %p1111_p2 = pnand %p1110_p1, %p1109_p0 }
  0x1e   : > { %p1112_p3 = pneg %p1111_p2 }
  0x20   : > { %p1117_p6 = pnand %p1115_p5, %p1112_p3 }
  0x22   : > { %1120 = shalt.err (!%p1117_p6)
}
  0x23   : > { %s1121_s25 = scalar_lea.vmem %s203_s10, 3328  ;;  %p1129_p8 = scmp.lt.s32.totalorder %s203_s10, %s203_s10 }
  0x24   : > { %p1122_p7 = scmp.ne.s32.totalorder %s203_s10, %s1121_s25  ;;  %p1130_p4 = scmp.lt.s32.totalorder %s1121_s25, %s1121_s25 }
  0x26   : > { %p1124_p9 = pnand %p1122_p7, %p1110_p1  ;;  %p1131_p11 = por %p1130_p4, %p1129_p8 }
  0x28   : > { %p1125_p12 = pneg %p1124_p9 }
  0x2a   : > { %p1132_p10 = pnand %p1131_p11, %p1125_p12 }
  0x2c   : > { %1135 = shalt.err (!%p1132_p10)
}
  0x2d   : > { %s1253_s27 = smov 64   ;;  %s1254_s29 = smov 4  }
  0x2e   : > { %1018 = dma.hbm_to_vmem [thread:$0]  (!%p1356_p13), %s1529_s2, 3328, %s203_s10, [#allocation3], %s1253_s27, %s1253_s27, %s1254_s29  }
  0x2f   : > { %p1542_p0 = scmp.ne.s32.totalorder %s1539_s7, 0 }
  0x30   : > { %p1543_p2 = scmp.ne.s32.totalorder (!%p1542_p0), %s1540_s8, 0 }
  0x31   : > { %239 = sbr.rel (%p1542_p0) target bundleno = 949 (0x3b5), region = 36 }
  0x38   : > { %1217 = dma.done.wait (%p1543_p2), [#allocation3], 3328  }
  0x39   : > { %1219 = vsyncadd (%p1543_p2), [#allocation3], 4294963968  ;;  %p281_p4 = scmp.lt.s32.totalorder %s1242_s21, 1  ;;  %v1255_v0 = vmov 0.0   ;;  %vm1256_vm0 = vmmov 0   ;;  %v1082_v1 = vld [vmem:[#allocation2] sm:$0xff]  }
  0x3a   : > { %939 = vmatprep.subr.bf16.mxu0 %v1255_v0  ;;  %943 = vmatprep.mubr.msk.bf16.mxu0 %vm1256_vm0, %v1255_v0  ;;  %v1083_v2 = vld [vmem:[#allocation2 + $0x8] sm:$0xff]   ;;  %v1084_v4 = vld [vmem:[#allocation2 + $0x10] sm:$0xff]   ;;  %v1085_v6 = vld [vmem:[#allocation2 + $0x18] sm:$0xff]   ;;  %vm368_vm1 = vcmask 261120   ;;  %s1435_s25 = sand.u32 1, %s1234_s19   ;;  %p1544_p10 = scmp.ne.s32.totalorder %s1537_s28, 0 }
  0x3b   : > { %947 = vmatprep.subr.bf16.mxu1 %v1255_v0  ;;  %963 = vmatprep.mubr.msk.bf16.mxu1 %vm1256_vm0, %v1255_v0  ;;  %s1390_s7 = scalar_select %p281_p4, %s1242_s21, 1  ;;  %v1086_v7 = vld [vmem:[#allocation2 + $0x20] sm:$0xff]   ;;  %v1087_v8 = vld [vmem:[#allocation2 + $0x28] sm:$0xff]   ;;  %v1088_v9 = vld [vmem:[#allocation2 + $0x30] sm:$0xff]  }
  0x3c   : > { %940 = vmatpush3.bf16.msra.mxu0 %v1082_v1  ;;  %948 = vmatpush3.bf16.msra.mxu1 %v1084_v4  ;;  %v1089_v10 = vld [vmem:[#allocation2 + $0x38] sm:$0xff]   ;;  %v1090_v11 = vld [vmem:[#allocation2 + $0x40] sm:$0xff]   ;;  %v1091_v12 = vld [vmem:[#allocation2 + $0x48] sm:$0xff]   ;;  %s869_s9 = sshll.u32 %s1435_s25, 3  ;;  %s703_s14 = scalar_lea.sflag [#allocation7], %s1435_s25 }
  0x3d   : > { %s871_s8 = sshll.u32 %s1390_s7, 3  ;;  %941 = vmatprep.subr.bf16.mxu0 %v1255_v0  ;;  %949 = vmatprep.subr.bf16.mxu1 %v1255_v0  ;;  %v1092_v13 = vld [vmem:[#allocation2 + $0x50] sm:$0xff]   ;;  %v1093_v14 = vld [vmem:[#allocation2 + $0x58] sm:$0xff]   ;;  %v1094_v15 = vld [vmem:[#allocation2 + $0x60] sm:$0xff]   ;;  %s278_s12 = scalar_lea.vmem [#allocation6], %s869_s9 }
  0x3e   : > { %s290_s13 = scalar_lea.vmem %s1528_s1, %s871_s8  ;;  %v1095_v16 = vld [vmem:[#allocation2 + $0x68] sm:$0xff]   ;;  %v1096_v17 = vld [vmem:[#allocation2 + $0x70] sm:$0xff]   ;;  %v1097_v18 = vld [vmem:[#allocation2 + $0x78] sm:$0xff]   ;;  %s286_s16 = scalar_lea.vmem %s1527_s0, %s871_s8 }
  0x3f   : > { %v296_v3 = vld [vmem:[%s290_s13] sm:$0xff]  ;;  %v1099_v28 = vld [vmem:[#allocation2 + $0x88] sm:$0xff]   ;;  %v1100_v29 = vld [vmem:[#allocation2 + $0x90] sm:$0xff]   ;;  %s905_s7 = sshll.u32 %s1242_s21, 7  ;;  %s731_s13 = sshll.u32 %s278_s12, 4  ;;  %s732_s13 = int_to_ptr.vmem [resolvable:$true] %s731_s13 }
  0x40   : > { %v355_v5 = vpack.c.bf16 %v296_v3, %v296_v3  ;;  %942 = vmatpush3.bf16.msra.mxu0 %v1083_v2  ;;  %950 = vmatpush3.bf16.msra.mxu1 %v1085_v6  ;;  %v354_v19 = vld [vmem:[%s286_s16] sm:$0xff]  ;;  %v1101_v30 = vld [vmem:[#allocation2 + $0x98] sm:$0xff]   ;;  %v1103_v32 = vld [vmem:[#allocation2 + $0xa8] sm:$0xff]   ;;  %s1449_s11 = scalar_lea.hbm %s1532_s5, %s905_s7  ;;  %s1136_s15 = scalar_lea.vmem %s732_s13, 128 }
  0x41   : > { %967 = vmatprep.subr.bf16.mxu0 %v1255_v0  ;;  %951 = vmatprep.subr.bf16.mxu1 %v1255_v0  ;;  %v1098_v27 = vld [vmem:[#allocation2 + $0x80] sm:$0xff]   ;;  %v1104_v33 = vld [vmem:[#allocation2 + $0xb0] sm:$0xff]   ;;  %v1105_v34 = vld [vmem:[#allocation2 + $0xb8] sm:$0xff]   ;;  %p1137_p8 = scmp.ne.s32.totalorder %s732_s13, %s1136_s15  ;;  %s1257_s16 = smov [#allocation6]  }
  0x42   : > { %v1102_v31 = vld [vmem:[#allocation2 + $0xa0] sm:$0xff]   ;;  %v1107_v44 = vld [vmem:[#allocation2 + $0xc8] sm:$0xff]   ;;  %s1140_s17 = sshll.u32 %s1257_s16, 4  ;;  %s1141_s17 = int_to_ptr.vmem [resolvable:$false] %s1140_s17 }
  0x43   : > { %944 = vmatmul.mubr.msk.bf16.vlgmr.msra.gmra.mrb[0].mxu0 %vm368_vm1, %v355_v5  ;;  %v876_v35 = vld [vmem:[%s1530_s3] ss:$0 sm:$0xff]  ;;  %v885_v45 = vld [vmem:[%s1530_s3 + $0x8] ss:$0 sm:$0xff]  ;;  %p1138_p11 = pnand %p1137_p8, %p1544_p10  ;;  %s1142_s24 = scalar_lea.vmem %s1141_s17, 256 }
  0x44   : > { %983 = vmatprep.mubr.msk.bf16.mxu0 %vm1256_vm0, %v1255_v0  ;;  %952 = vmatpush3.bf16.msra.mxu1 %v1086_v7  ;;  %v1106_v43 = vld [vmem:[#allocation2 + $0xc0] sm:$0xff]   ;;  %p1143_p1 = scmp.lt.s32.totalorder %s732_s13, %s1141_s17  ;;  %p1144_p3 = scmp.lt.s32.totalorder %s1142_s24, %s1136_s15 }
  0x45   : > { %953 = vmatprep.subr.bf16.mxu1 %v1255_v0  ;;  %968 = vmatpush3.bf16.msra.mxu0 %v1092_v13  ;;  %p1139_p13 = pneg %p1138_p11 }
  0x46   : > { %969 = vmatprep.subr.bf16.mxu0 %v1255_v0  ;;  %p1145_p5 = por %p1144_p3, %p1143_p1 }
  0x48   : > { %954 = vmatpush3.bf16.msra.mxu1 %v1087_v8  ;;  %p1146_p6 = pnand %p1145_p5, %p1139_p13 }
  0x49   : > { %955 = vmatprep.subr.bf16.mxu1 %v1255_v0  ;;  %970 = vmatpush3.bf16.msra.mxu0 %v1093_v14 }
  0x4a   : > { %971 = vmatprep.subr.bf16.mxu0 %v1255_v0 }
  0x4c   : > { %956 = vmatpush3.bf16.msra.mxu1 %v1088_v9 }
  0x4d   : > { %957 = vmatprep.subr.bf16.mxu1 %v1255_v0  ;;  %972 = vmatpush3.bf16.msra.mxu0 %v1094_v15 }
  0x4e   : > { %973 = vmatprep.subr.bf16.mxu0 %v1255_v0 }
  0x50   : > { %958 = vmatpush3.bf16.msra.mxu1 %v1089_v10 }
  0x51   : > { %959 = vmatprep.subr.bf16.mxu1 %v1255_v0  ;;  %974 = vmatpush3.bf16.msra.mxu0 %v1095_v16 }
  0x52   : > { %975 = vmatprep.subr.bf16.mxu0 %v1255_v0 }
  0x54   : > { %960 = vmatpush3.bf16.msra.mxu1 %v1090_v11 }
  0x55   : > { %961 = vmatprep.subr.bf16.mxu1 %v1255_v0  ;;  %976 = vmatpush3.bf16.msra.mxu0 %v1096_v17 }
  0x56   : > { %977 = vmatprep.subr.bf16.mxu0 %v1255_v0 }
  0x58   : > { %962 = vmatpush3.bf16.msra.mxu1 %v1091_v12 }
  0x59   : > { %987 = vmatprep.subr.bf16.mxu1 %v1255_v0  ;;  %978 = vmatpush3.bf16.msra.mxu0 %v1097_v18 }
  0x5a   : > { %979 = vmatprep.subr.bf16.mxu0 %v1255_v0 }
  0x5d   : > { %980 = vmatpush3.bf16.msra.mxu0 %v1098_v27 }
  0x5e   : > { %981 = vmatprep.subr.bf16.mxu0 %v1255_v0 }
  0x61   : > { %982 = vmatpush3.bf16.msra.mxu0 %v1099_v28 }
 0x116   : > { %v406_v20 = vpop.f32.mrb[0].mxu0 }
 0x117   : > { %v412_v21 = vadd.f32 %v406_v20, %v354_v19  ;;  %v945_v22 = vpop.f32.mrb[1].mxu0 }
 0x118   : > { %v409_v23 = vpop.f32.mrb[2].mxu0 }
 0x119   : > { %v413_v24 = vmax.f32 %v412_v21, 0.0  ;;  %v946_v25 = vpop.f32.mrb[3].mxu0 }
 0x11b   : > { %v414_v26 = vpack.c.bf16 %v413_v24, %v413_v24 }
 0x11d   : > { %964 = vmatmul.mubr.bf16.vlgmr.msra.gmra.mrb[0].mxu1 %v414_v26 }
 0x11e   : > { %1003 = vmatprep.mubr.msk.bf16.mxu1 %vm1256_vm0, %v1255_v0  ;;  %988 = vmatpush3.bf16.msra.mxu1 %v1100_v29 }
 0x11f   : > { %989 = vmatprep.subr.bf16.mxu1 %v1255_v0 }
 0x122   : > { %990 = vmatpush3.bf16.msra.mxu1 %v1101_v30 }
 0x123   : > { %991 = vmatprep.subr.bf16.mxu1 %v1255_v0 }
 0x126   : > { %992 = vmatpush3.bf16.msra.mxu1 %v1102_v31 }
 0x127   : > { %993 = vmatprep.subr.bf16.mxu1 %v1255_v0 }
 0x12a   : > { %994 = vmatpush3.bf16.msra.mxu1 %v1103_v32 }
 0x12b   : > { %995 = vmatprep.subr.bf16.mxu1 %v1255_v0 }
 0x12e   : > { %996 = vmatpush3.bf16.msra.mxu1 %v1104_v33 }
 0x12f   : > { %997 = vmatprep.subr.bf16.mxu1 %v1255_v0 }
 0x132   : > { %998 = vmatpush3.bf16.msra.mxu1 %v1105_v34 }
 0x133   : > { %999 = vmatprep.subr.bf16.mxu1 %v1255_v0 }
 0x136   : > { %1000 = vmatpush3.bf16.msra.mxu1 %v1106_v43 }
 0x137   : > { %1001 = vmatprep.subr.bf16.mxu1 %v1255_v0 }
 0x13a   : > { %1002 = vmatpush3.bf16.msra.mxu1 %v1107_v44 }
 0x1f0   : > { %v501_v36 = vpop.f32.mrb[0].mxu1 }
 0x1f1   : > { %v502_v37 = vadd.f32 %v876_v35, %v501_v36  ;;  %v965_v38 = vpop.f32.mrb[1].mxu1 }
 0x1f2   : > { %v504_v39 = vpop.f32.mrb[2].mxu1 }
 0x1f3   : > { %v507_v40 = vmax.f32 %v502_v37, 0.0  ;;  %v966_v41 = vpop.f32.mrb[3].mxu1 }
 0x1f5   : > { %v508_v42 = vpack.c.bf16 %v507_v40, %v507_v40 }
 0x1f7   : > { %984 = vmatmul.mubr.bf16.vlgmr.msra.gmra.mrb[4].mxu0 %v508_v42 }
 0x2ca   : > { %v595_v46 = vpop.f32.mrb[4].mxu0 }
 0x2cb   : > { %v596_v47 = vadd.f32 %v885_v45, %v595_v46  ;;  %v985_v48 = vpop.f32.mrb[5].mxu0 }
 0x2cc   : > { %v598_v49 = vpop.f32.mrb[6].mxu0 }
 0x2cd   : > { %v601_v50 = vmax.f32 %v596_v47, 0.0  ;;  %v986_v51 = vpop.f32.mrb[7].mxu0 }
 0x2cf   : > { %v602_v52 = vpack.c.bf16 %v601_v50, %v601_v50  ;;  %696 = vst [vmem:[%s278_s12] sm:$0xff] %v601_v50 }
 0x2d1   : > { %1004 = vmatmul.mubr.bf16.vlgmr.msra.gmra.mrb[4].mxu1 %v602_v52 }
 0x2d2   : > { %1149 = shalt.err (!%p1146_p6)
}
 0x2d3   : > { %s1150_s27 = scalar_lea.hbm %s1449_s11, 128  ;;  %s1154_s8 = scalar_lea.hbm %s1532_s5, 256 }
 0x2d4   : > { %p1151_p7 = scmp.ne.s32.totalorder %s1449_s11, %s1150_s27  ;;  %p1155_p0 = scmp.lt.u32.totalorder %s1449_s11, %s1532_s5 }
 0x2d5   : > { %p1156_p2 = scmp.lt.u32.totalorder %s1154_s8, %s1150_s27  ;;  %p1158_p8 = scmp.lt.u32.totalorder %s1150_s27, %s1449_s11 }
 0x2d6   : > { %p1152_p9 = pnand %p1151_p7, %p1544_p10 }
 0x2d7   : > { %p1157_p4 = por %p1156_p2, %p1155_p0 }
 0x2d8   : > { %p1153_p12 = pneg %p1152_p9 }
 0x2d9   : > { %p1159_p11 = por %p1158_p8, %p1157_p4 }
 0x2db   : > { %p1160_p13 = pnand %p1159_p11, %p1153_p12 }
 0x2dd   : > { %1163 = shalt.err (!%p1160_p13)
}
 0x2de   : > { %1012 = dma.vmem_to_hbm [thread:$0]  (%p1544_p10), %s732_s13, 128, %s1449_s11, %s703_s14   ;;  %v894_v53 = vld [vmem:[%s1530_s3 + $0x10] ss:$0 sm:$0xff] }
 0x2df   : > { %s271_s24 = scalar_lea.vmem [#allocation5], %s869_s9  ;;  %s1479_s8 = scalar_lea.hbm %s1531_s4, %s905_s7 }
 0x2e0   : > { %s718_s29 = sshll.u32 %s271_s24, 4  ;;  %s698_s11 = scalar_lea.sflag [#allocation4], %s1435_s25  ;;  %s1481_s29 = int_to_ptr.vmem [resolvable:$true] %s718_s29 }
 0x2e1   : > { %s1164_s9 = scalar_lea.vmem %s1481_s29, 128  ;;  %s1258_s21 = smov [#allocation5]  }
 0x2e2   : > { %p1165_p1 = scmp.ne.s32.totalorder %s1481_s29, %s1164_s9  ;;  %s1168_s13 = sshll.u32 %s1258_s21, 4  ;;  %s1169_s13 = int_to_ptr.vmem [resolvable:$false] %s1168_s13 }
 0x2e3   : > { %s1170_s14 = scalar_lea.vmem %s1169_s13, 256  ;;  %p1171_p6 = scmp.lt.s32.totalorder %s1481_s29, %s1169_s13 }
 0x2e4   : > { %p1166_p3 = pnand %p1165_p1, %p1544_p10  ;;  %p1172_p7 = scmp.lt.s32.totalorder %s1170_s14, %s1164_s9 }
 0x2e6   : > { %p1167_p5 = pneg %p1166_p3  ;;  %p1173_p9 = por %p1172_p7, %p1171_p6 }
 0x2e8   : > { %p1174_p12 = pnand %p1173_p9, %p1167_p5 }
 0x3a4   : > { %v689_v54 = vpop.f32.mrb[4].mxu1 }
 0x3a5   : > { %v690_v55 = vadd.f32 %v894_v53, %v689_v54  ;;  %v1005_v56 = vpop.f32.mrb[5].mxu1 }
 0x3a6   : > { %v692_v57 = vpop.f32.mrb[6].mxu1 }
 0x3a7   : > { %695 = vst [vmem:[%s271_s24] sm:$0xff] %v690_v55  ;;  %v1006_v58 = vpop.f32.mrb[7].mxu1 }
 0x3a8   : > { %1177 = shalt.err (!%p1174_p12)
}
 0x3a9   : > { %s1178_s25 = scalar_lea.hbm %s1479_s8, 128  ;;  %s1182_s16 = scalar_lea.hbm %s1531_s4, 256 }
 0x3aa   : > { %p1179_p0 = scmp.ne.s32.totalorder %s1479_s8, %s1178_s25  ;;  %p1183_p8 = scmp.lt.u32.totalorder %s1479_s8, %s1531_s4 }
 0x3ab   : > { %p1184_p11 = scmp.lt.u32.totalorder %s1182_s16, %s1178_s25  ;;  %p1186_p1 = scmp.lt.u32.totalorder %s1178_s25, %s1479_s8 }
 0x3ac   : > { %p1180_p2 = pnand %p1179_p0, %p1544_p10 }
 0x3ad   : > { %p1185_p13 = por %p1184_p11, %p1183_p8 }
 0x3ae   : > { %p1181_p4 = pneg %p1180_p2 }
 0x3af   : > { %p1187_p3 = por %p1186_p1, %p1185_p13 }
 0x3b1   : > { %p1188_p5 = pnand %p1187_p3, %p1181_p4 }
 0x3b3   : > { %1191 = shalt.err (!%p1188_p5)
}
 0x3b4   : > { %1011 = dma.vmem_to_hbm [thread:$0]  (%p1544_p10), %s1481_s29, 128, %s1479_s8, %s698_s11  }
 0x3b5 PF: > { %p1028_p6 = scmp.ge.s32.totalorder %s1250_s23, 2  ;;  %s743_s24 = sand.u32 1, %s1230_s18  }
 0x3b6   : > { %p1545_p7 = scmp.ne.s32.totalorder %s1538_s30, 0  ;;  %s744_s27 = scalar_lea.sflag [#allocation4], %s743_s24 }
 0x3b8   : > { %p1020_p9 = pnand %p1028_p6, %p1545_p7 }
 0x3ba   : > { %1221 = dma.done.wait (!%p1020_p9), %s744_s27, 128  }
 0x3bb   : > { %1223 = vsyncadd (!%p1020_p9), %s744_s27, 4294967168  ;;  %s753_s12 = scalar_lea.sflag [#allocation7], %s743_s24 }
 0x3bc   : > { %1225 = dma.done.wait (!%p1020_p9), %s753_s12, 128  }
 0x3bd   : > { %1227 = vsyncadd (!%p1020_p9), %s753_s12, 4294967168  ;;  %s23_s23 = sadd.s32 1, %s1250_s23   ;;  %s1546_s18 = smov %s1234_s19 }
 0x3be   : > { %p20_p12 = scmp.ge.s32.totalorder %s23_s23, 4   ;;  %s1547_s19 = smov %s1238_s20 }
 0x3bf   : > { %s1548_s20 = smov %s1342_s6  ;;  %s1549_s21 = smov %s1246_s22 }
 0x3c0   : > { %s1550_s22 = smov %s1552_s26  ;;  %22 = sbr.rel (!%p20_p12) target bundleno = 7 (0x7), region = 100 }
 0x3c7   :  { %758 = vsyncpa [#allocation3], 1 }
 0x3c8   :  { %760 = vsyncpa [#allocation3 + $0x1], 1 }
 0x3c9   :  { %761 = vsyncpa [#allocation4], 1 }
 0x3ca   :  { %763 = vsyncpa [#allocation4 + $0x1], 1 }
 0x3cb   :  { %764 = vsyncpa [#allocation7], 1 }
 0x3cc   :  { %766 = vsyncpa [#allocation7 + $0x1], 1 }

</bundles_post_ra>
